<compile_context>
chip_gen: v7x
topology: tpu7x:2x2x1
jax: 0.10.0
libtpu: 0.0.40
codegen_flags: <defaults>
</compile_context>

<pallas_src>
import jax
import jax.numpy as jnp
from jax.experimental import pallas as pl
from jax.experimental.pallas import tpu as pltpu

EPS = 1e-5

# Per-grid-step VMEM budget (resident weights + double-buffered activation
# tiles + f32 intermediates).  44 MiB leaves headroom under v7x's 64 MiB
# physical VMEM; v5e/v6e (128 MiB) could go higher, but this keeps one config
# working on all three generations.
_VMEM_BUDGET = 44 * 1024 * 1024
_VMEM_LIMIT_CAP = 56 * 1024 * 1024  # requested scoped-VMEM limit (< v7x physical)


def _round_up(x, m):
    return ((x + m - 1) // m) * m


def mlp_kernel(x_ref, w1_ref, b1_ref, w2_ref, b2_ref, g2_ref, be2_ref, o_ref):
    # ---- Linear 1 on the MXU.  Cast the activation tile to the weight dtype
    # so bf16 params use the bf16 MXU fast path; accumulation stays f32.
    x = x_ref[...].astype(w1_ref.dtype)
    h = jnp.dot(x, w1_ref[...], preferred_element_type=jnp.float32) + b1_ref[...]

    # ---- LayerNorm 1 over the true hidden dim (f32, two-pass variance).
    # LN1's affine (g1, be1) was folded into w2/b2 at prep time.
    mu = jnp.mean(h, axis=-1, keepdims=True)
    d = h - mu
    var = jnp.mean(d * d, axis=-1, keepdims=True)
    hn = d * jax.lax.rsqrt(var + EPS)

    # ---- Linear 2 on the MXU (weights carry the folded LN1 affine).
    y = jnp.dot(hn.astype(w2_ref.dtype), w2_ref[...],
                preferred_element_type=jnp.float32) + b2_ref[...]

    # ---- LayerNorm 2 over the true output dim (f32) + affine.
    mu2 = jnp.mean(y, axis=-1, keepdims=True)
    d2 = y - mu2
    var2 = jnp.mean(d2 * d2, axis=-1, keepdims=True)
    out = d2 * jax.lax.rsqrt(var2 + EPS) * g2_ref[...] + be2_ref[...]

    o_ref[...] = out.astype(o_ref.dtype)


def init_params(key, input_dim, hidden_dim, output_dim, dtype=jnp.float32):
    """PyTorch-layout parameters: Linear weights are (out_features, in_features)."""
    k1, k2, k3, k4, k5, k6 = jax.random.split(key, 6)
    bound1 = 1.0 / (input_dim ** 0.5)
    w1 = jax.random.uniform(k1, (hidden_dim, input_dim), dtype, -bound1, bound1)
    b1 = jax.random.uniform(k2, (hidden_dim,), dtype, -bound1, bound1)
    bound2 = 1.0 / (hidden_dim ** 0.5)
    w2 = jax.random.uniform(k3, (output_dim, hidden_dim), dtype, -bound2, bound2)
    b2 = jax.random.uniform(k4, (output_dim,), dtype, -bound2, bound2)
    # LayerNorm affines (perturbed from the 1/0 defaults so the fold is exercised).
    g1 = jnp.ones((hidden_dim,), dtype) + 0.1 * jax.random.normal(k5, (hidden_dim,), dtype)
    be1 = 0.1 * jax.random.normal(k6, (hidden_dim,), dtype)
    g2 = jnp.ones((output_dim,), dtype)
    be2 = jnp.zeros((output_dim,), dtype)
    return (w1, b1, g1, be1, w2, b2, g2, be2)


def prepare_params(params, compute_dtype=None):
    """Host-side prep: fold the LN1 affine into linear 2 and pre-transpose the
    weights to (K, N).  `compute_dtype` optionally recasts the matmul weights
    (bf16 recommended on v5e, and on v7x when f32 weights would not fit the
    64 MiB resident-weight budget)."""
    (w1, b1, g1, be1, w2, b2, g2, be2) = params
    if compute_dtype is None:
        compute_dtype = w1.dtype

    # Fold LN1 affine into linear 2 (in f32 for accuracy):
    #   (hn * g1 + be1) @ w2.T + b2 == hn @ (w2 * g1).T + (w2 @ be1 + b2)
    w2f = w2.astype(jnp.float32)
    w2_fold = w2f * g1.astype(jnp.float32)[None, :]
    b2_fold = b2.astype(jnp.float32) + w2f @ be1.astype(jnp.float32)

    w1t = w1.T.astype(compute_dtype)          # (input_dim, hidden_dim)
    w2t = w2_fold.T.astype(compute_dtype)     # (hidden_dim, output_dim)

    # Biases / LN2 affine stay f32 (they feed f32 math directly).
    b1p = b1.astype(jnp.float32).reshape(1, -1)
    b2p = b2_fold.reshape(1, -1)
    g2p = g2.astype(jnp.float32).reshape(1, -1)
    be2p = be2.astype(jnp.float32).reshape(1, -1)
    return (w1t, b1p, w2t, b2p, g2p, be2p)


def _pick_batch_tile(batch, block_batch, per_row_bytes, fixed_bytes):
    """Batch-tile rows: multiple of 8 sublanes (256 granularity when large),
    small enough to fit the VMEM budget, and capped so the grid has >= 2
    steps when the batch allows (keeps both v7x TensorCores busy)."""
    batch8 = _round_up(batch, 8)
    tb = min(block_batch, batch8)
    if batch8 >= 128:  # enough rows to split across two cores
        tb = min(tb, _round_up(batch8 // 2, 8))
    gran = 256 if tb >= 256 else 8
    tb = max((tb // gran) * gran, 8)
    while tb > gran and fixed_bytes + tb * per_row_bytes > _VMEM_BUDGET:
        tb -= gran
    return max(tb, 8)


def simple_mlp_forward(x, prepared, *, block_batch=512):
    (w1t, b1p, w2t, b2p, g2p, be2p) = prepared
    input_dim, hidden_dim = w1t.shape
    output_dim = w2t.shape[1]
    batch = x.shape[0]

    # VMEM accounting (constant-index inputs are single-buffered, activations
    # double-buffered by the pipeline, LN intermediates live in f32).
    w_bytes = w1t.dtype.itemsize
    fixed_bytes = ((w1t.size + w2t.size) * w_bytes
                   + (b1p.size + b2p.size + g2p.size + be2p.size) * 4)
    per_row_bytes = (2 * input_dim * x.dtype.itemsize          # x tile (x2 buffers)
                     + 2 * output_dim * x.dtype.itemsize        # out tile (x2 buffers)
                     + (2 * hidden_dim + 2 * output_dim) * 4)   # f32 h/hn/y intermediates
    tb = _pick_batch_tile(batch, block_batch, per_row_bytes, fixed_bytes)
    grid = (pl.cdiv(batch, tb),)

    needed = fixed_bytes + tb * per_row_bytes
    vmem_limit = int(min(max(2 * needed, 32 * 1024 * 1024), _VMEM_LIMIT_CAP))

    # Constant-index blocks never need double buffering.
    resident = pl.Buffered(1)

    out = pl.pallas_call(
        mlp_kernel,
        out_shape=jax.ShapeDtypeStruct((batch, output_dim), x.dtype),
        grid=grid,
        in_specs=[
            pl.BlockSpec((tb, input_dim), lambda i: (i, 0)),              # x: tiled over batch
            pl.BlockSpec((input_dim, hidden_dim), lambda i: (0, 0),
                         pipeline_mode=resident),                          # w1t (resident)
            pl.BlockSpec((1, hidden_dim), lambda i: (0, 0),
                         pipeline_mode=resident),                          # b1
            pl.BlockSpec((hidden_dim, output_dim), lambda i: (0, 0),
                         pipeline_mode=resident),                          # w2t (LN1-folded)
            pl.BlockSpec((1, output_dim), lambda i: (0, 0),
                         pipeline_mode=resident),                          # b2 (LN1-folded)
            pl.BlockSpec((1, output_dim), lambda i: (0, 0),
                         pipeline_mode=resident),                          # g2
            pl.BlockSpec((1, output_dim), lambda i: (0, 0),
                         pipeline_mode=resident),                          # be2
        ],
        out_specs=pl.BlockSpec((tb, output_dim), lambda i: (i, 0)),
        compiler_params=pltpu.CompilerParams(
            dimension_semantics=("parallel",),
            vmem_limit_bytes=vmem_limit),
    )(x, w1t, b1p, w2t, b2p, g2p, be2p)
    return out


def reference_forward(x, params):
    (w1, b1, g1, be1, w2, b2, g2, be2) = params
    xf = x.astype(jnp.float32)
    h = xf @ w1.astype(jnp.float32).T + b1
    mu = h.mean(-1, keepdims=True)
    var = ((h - mu) ** 2).mean(-1, keepdims=True)
    h = (h - mu) * jax.lax.rsqrt(var + EPS) * g1 + be1
    y = h @ w2.astype(jnp.float32).T + b2
    mu2 = y.mean(-1, keepdims=True)
    var2 = ((y - mu2) ** 2).mean(-1, keepdims=True)
    return ((y - mu2) * jax.lax.rsqrt(var2 + EPS) * g2 + be2).astype(x.dtype)


if __name__ == "__main__":
    key = jax.random.PRNGKey(0)
    batch, input_dim, hidden_dim, output_dim = 8, 32, 64, 32
    kx, kp = jax.random.split(key)
    x = jax.random.normal(kx, (batch, input_dim), jnp.float32)
    params = init_params(kp, input_dim, hidden_dim, output_dim, jnp.float32)
    prepared = prepare_params(params)

    out = simple_mlp_forward(x, prepared)
    out = jax.block_until_ready(out)

    ref = reference_forward(x, params)
    assert out.shape == (batch, output_dim), out.shape
    max_err = float(jnp.max(jnp.abs(out - ref)))
    assert jnp.allclose(out, ref, atol=2e-4, rtol=2e-4), max_err
    print("KERNEL_OK")
</pallas_src>

<mosaic_0001>
module attributes {stable_mosaic.version = 11 : i64} {
  func.func @mlp_kernel(%arg0: i32, %arg1: memref<8x32xf32, #tpu.memory_space<vmem>>, %arg2: memref<32x64xf32, #tpu.memory_space<vmem>>, %arg3: memref<1x64xf32, #tpu.memory_space<vmem>>, %arg4: memref<64x32xf32, #tpu.memory_space<vmem>>, %arg5: memref<1x32xf32, #tpu.memory_space<vmem>>, %arg6: memref<1x32xf32, #tpu.memory_space<vmem>>, %arg7: memref<1x32xf32, #tpu.memory_space<vmem>>, %arg8: memref<8x32xf32, #tpu.memory_space<vmem>>) attributes {dimension_semantics = [#tpu.dimension_semantics<parallel>], iteration_bounds = array<i64: 1>, scalar_prefetch = 0 : i64, scratch_operands = 0 : i64, tpu.core_type = #tpu.core_type<tc>, window_params = [{transform_indices = @transform_0, window_bounds = array<i64: 8, 32>}, {pipeline_mode = #tpu.pipeline_mode<synchronous>, transform_indices = @transform_1, window_bounds = array<i64: 32, 64>}, {pipeline_mode = #tpu.pipeline_mode<synchronous>, transform_indices = @transform_2, window_bounds = array<i64: 1, 64>}, {pipeline_mode = #tpu.pipeline_mode<synchronous>, transform_indices = @transform_3, window_bounds = array<i64: 64, 32>}, {pipeline_mode = #tpu.pipeline_mode<synchronous>, transform_indices = @transform_4, window_bounds = array<i64: 1, 32>}, {pipeline_mode = #tpu.pipeline_mode<synchronous>, transform_indices = @transform_5, window_bounds = array<i64: 1, 32>}, {pipeline_mode = #tpu.pipeline_mode<synchronous>, transform_indices = @transform_6, window_bounds = array<i64: 1, 32>}, {transform_indices = @transform_7, window_bounds = array<i64: 8, 32>}]} {
    %c0 = arith.constant 0 : index
    %c0_0 = arith.constant 0 : index
    %0 = vector.load %arg1[%c0, %c0_0] : memref<8x32xf32, #tpu.memory_space<vmem>>, vector<8x32xf32>
    %c0_1 = arith.constant 0 : index
    %c0_2 = arith.constant 0 : index
    %1 = vector.load %arg2[%c0_1, %c0_2] : memref<32x64xf32, #tpu.memory_space<vmem>>, vector<32x64xf32>
    %cst = arith.constant dense<0.000000e+00> : vector<8x64xf32>
    %2 = tpu.matmul %0, %1, %cst {dimension_numbers = #tpu.dot_dimension_numbers<[1], [0], [0], [1], [0, 0, 1, 1], [], []>} : vector<8x32xf32>, vector<32x64xf32>, vector<8x64xf32> -> vector<8x64xf32>
    %c0_3 = arith.constant 0 : index
    %c0_4 = arith.constant 0 : index
    %3 = vector.load %arg3[%c0_3, %c0_4] : memref<1x64xf32, #tpu.memory_space<vmem>>, vector<1x64xf32>
    %4 = vector.broadcast %3 : vector<1x64xf32> to vector<8x64xf32>
    %5 = arith.addf %2, %4 : vector<8x64xf32>
    %cst_5 = arith.constant dense<0.000000e+00> : vector<8xf32>
    %6 = vector.multi_reduction <add>, %5, %cst_5 [1] : vector<8x64xf32> to vector<8xf32>
    %7 = vector.shape_cast %6 : vector<8xf32> to vector<8x1xf32>
    %cst_6 = arith.constant 6.400000e+01 : f32
    %8 = vector.broadcast %cst_6 : f32 to vector<8x1xf32>
    %9 = arith.divf %7, %8 : vector<8x1xf32>
    %10 = vector.broadcast %9 : vector<8x1xf32> to vector<8x64xf32>
    %11 = arith.subf %5, %10 : vector<8x64xf32>
    %12 = arith.mulf %11, %11 : vector<8x64xf32>
    %cst_7 = arith.constant dense<0.000000e+00> : vector<8xf32>
    %13 = vector.multi_reduction <add>, %12, %cst_7 [1] : vector<8x64xf32> to vector<8xf32>
    %14 = vector.shape_cast %13 : vector<8xf32> to vector<8x1xf32>
    %cst_8 = arith.constant 6.400000e+01 : f32
    %15 = vector.broadcast %cst_8 : f32 to vector<8x1xf32>
    %16 = arith.divf %14, %15 : vector<8x1xf32>
    %cst_9 = arith.constant 9.99999974E-6 : f32
    %17 = vector.broadcast %cst_9 : f32 to vector<8x1xf32>
    %18 = arith.addf %16, %17 : vector<8x1xf32>
    %19 = math.rsqrt %18 : vector<8x1xf32>
    %20 = vector.broadcast %19 : vector<8x1xf32> to vector<8x64xf32>
    %21 = arith.mulf %11, %20 : vector<8x64xf32>
    %c0_10 = arith.constant 0 : index
    %c0_11 = arith.constant 0 : index
    %22 = vector.load %arg4[%c0_10, %c0_11] : memref<64x32xf32, #tpu.memory_space<vmem>>, vector<64x32xf32>
    %cst_12 = arith.constant dense<0.000000e+00> : vector<8x32xf32>
    %23 = tpu.matmul %21, %22, %cst_12 {dimension_numbers = #tpu.dot_dimension_numbers<[1], [0], [0], [1], [0, 0, 1, 1], [], []>} : vector<8x64xf32>, vector<64x32xf32>, vector<8x32xf32> -> vector<8x32xf32>
    %c0_13 = arith.constant 0 : index
    %c0_14 = arith.constant 0 : index
    %24 = vector.load %arg5[%c0_13, %c0_14] : memref<1x32xf32, #tpu.memory_space<vmem>>, vector<1x32xf32>
    %25 = vector.broadcast %24 : vector<1x32xf32> to vector<8x32xf32>
    %26 = arith.addf %23, %25 : vector<8x32xf32>
    %cst_15 = arith.constant dense<0.000000e+00> : vector<8xf32>
    %27 = vector.multi_reduction <add>, %26, %cst_15 [1] : vector<8x32xf32> to vector<8xf32>
    %28 = vector.shape_cast %27 : vector<8xf32> to vector<8x1xf32>
    %cst_16 = arith.constant 3.200000e+01 : f32
    %29 = vector.broadcast %cst_16 : f32 to vector<8x1xf32>
    %30 = arith.divf %28, %29 : vector<8x1xf32>
    %31 = vector.broadcast %30 : vector<8x1xf32> to vector<8x32xf32>
    %32 = arith.subf %26, %31 : vector<8x32xf32>
    %33 = arith.mulf %32, %32 : vector<8x32xf32>
    %cst_17 = arith.constant dense<0.000000e+00> : vector<8xf32>
    %34 = vector.multi_reduction <add>, %33, %cst_17 [1] : vector<8x32xf32> to vector<8xf32>
    %35 = vector.shape_cast %34 : vector<8xf32> to vector<8x1xf32>
    %cst_18 = arith.constant 3.200000e+01 : f32
    %36 = vector.broadcast %cst_18 : f32 to vector<8x1xf32>
    %37 = arith.divf %35, %36 : vector<8x1xf32>
    %cst_19 = arith.constant 9.99999974E-6 : f32
    %38 = vector.broadcast %cst_19 : f32 to vector<8x1xf32>
    %39 = arith.addf %37, %38 : vector<8x1xf32>
    %40 = math.rsqrt %39 : vector<8x1xf32>
    %41 = vector.broadcast %40 : vector<8x1xf32> to vector<8x32xf32>
    %42 = arith.mulf %32, %41 : vector<8x32xf32>
    %c0_20 = arith.constant 0 : index
    %c0_21 = arith.constant 0 : index
    %43 = vector.load %arg6[%c0_20, %c0_21] : memref<1x32xf32, #tpu.memory_space<vmem>>, vector<1x32xf32>
    %44 = vector.broadcast %43 : vector<1x32xf32> to vector<8x32xf32>
    %45 = arith.mulf %42, %44 : vector<8x32xf32>
    %c0_22 = arith.constant 0 : index
    %c0_23 = arith.constant 0 : index
    %46 = vector.load %arg7[%c0_22, %c0_23] : memref<1x32xf32, #tpu.memory_space<vmem>>, vector<1x32xf32>
    %47 = vector.broadcast %46 : vector<1x32xf32> to vector<8x32xf32>
    %48 = arith.addf %45, %47 : vector<8x32xf32>
    %c0_24 = arith.constant 0 : index
    %c0_25 = arith.constant 0 : index
    %49 = vector.load %arg8[%c0_24, %c0_25] : memref<8x32xf32, #tpu.memory_space<vmem>>, vector<8x32xf32>
    tpu.vector_store %arg8[%c0_24, %c0_25], %48 {strides = array<i32>} : memref<8x32xf32, #tpu.memory_space<vmem>>, vector<8x32xf32>,
    return
  }
  func.func @transform_0(%arg0: i32) -> (i32, i32) {
    %c0_i32 = arith.constant 0 : i32
    %c0_i32_0 = arith.constant 0 : i32
    return %arg0, %c0_i32 : i32, i32
  }
  func.func @transform_1(%arg0: i32) -> (i32, i32) {
    %c0_i32 = arith.constant 0 : i32
    %c0_i32_0 = arith.constant 0 : i32
    %c0_i32_1 = arith.constant 0 : i32
    return %c0_i32, %c0_i32_0 : i32, i32
  }
  func.func @transform_2(%arg0: i32) -> (i32, i32) {
    %c0_i32 = arith.constant 0 : i32
    %c0_i32_0 = arith.constant 0 : i32
    %c0_i32_1 = arith.constant 0 : i32
    return %c0_i32, %c0_i32_0 : i32, i32
  }
  func.func @transform_3(%arg0: i32) -> (i32, i32) {
    %c0_i32 = arith.constant 0 : i32
    %c0_i32_0 = arith.constant 0 : i32
    %c0_i32_1 = arith.constant 0 : i32
    return %c0_i32, %c0_i32_0 : i32, i32
  }
  func.func @transform_4(%arg0: i32) -> (i32, i32) {
    %c0_i32 = arith.constant 0 : i32
    %c0_i32_0 = arith.constant 0 : i32
    %c0_i32_1 = arith.constant 0 : i32
    return %c0_i32, %c0_i32_0 : i32, i32
  }
  func.func @transform_5(%arg0: i32) -> (i32, i32) {
    %c0_i32 = arith.constant 0 : i32
    %c0_i32_0 = arith.constant 0 : i32
    %c0_i32_1 = arith.constant 0 : i32
    return %c0_i32, %c0_i32_0 : i32, i32
  }
  func.func @transform_6(%arg0: i32) -> (i32, i32) {
    %c0_i32 = arith.constant 0 : i32
    %c0_i32_0 = arith.constant 0 : i32
    %c0_i32_1 = arith.constant 0 : i32
    return %c0_i32, %c0_i32_0 : i32, i32
  }
  func.func @transform_7(%arg0: i32) -> (i32, i32) {
    %c0_i32 = arith.constant 0 : i32
    %c0_i32_0 = arith.constant 0 : i32
    return %arg0, %c0_i32 : i32, i32
  }
}

</mosaic_0001>

<bundles_post_ra>
// kernel: tpu_custom_call.1
= control target key start
LH: loop header
LB: loop body
LE: loop exit
PB: predicated region body
PF: predicated region fallthrough
CT: control target
= control target key end

     0   :  { %v361_v3 = vmov 0.0|0.0   ;;  %vm362_vm0 = vmmov 0   ;;  %v363_v6 = vmov 0.0   ;;  %s475_s0 = inlined_call_operand.vmem [shape: f32[8,32], index: 0, kind: input, shape index: {}]   ;;  %s476_s1 = inlined_call_operand.vmem [shape: f32[32,64], index: 1, kind: input, shape index: {}]   ;;  %s477_s2 = inlined_call_operand.vmem [shape: f32[1,64], index: 2, kind: input, shape index: {}]   ;;  %s478_s3 = inlined_call_operand.vmem [shape: f32[64,32], index: 3, kind: input, shape index: {}]   ;;  %s479_s4 = inlined_call_operand.vmem [shape: f32[1,32], index: 4, kind: input, shape index: {}]   ;;  %s480_s5 = inlined_call_operand.vmem [shape: f32[1,32], index: 5, kind: input, shape index: {}]   ;;  %s481_s6 = inlined_call_operand.vmem [shape: f32[1,32], index: 6, kind: input, shape index: {}]   ;;  %s482_s7 = inlined_call_operand.hbm [shape: f32[8,32], index: 7, kind: output, shape index: {}]  }
   0x1   :  { %v28_v0 = vld [vmem:[%s476_s1] sm:$0xff]  ;;  %v29_v1 = vld [vmem:[%s476_s1 + $0x8] sm:$0xff]  ;;  %v30_v2 = vld [vmem:[%s476_s1 + $0x10] sm:$0xff]  ;;  %311 = vmatprep.subr.bf16.mxu0 %v361_v3  ;;  %289 = vmatprep.mubr.msk.f32.mxu0 %vm362_vm0, %v363_v6 }
   0x2   :  { %v312_v4 = vpack.c.bf16 %v29_v1, %v28_v0  ;;  %v31_v5 = vld [vmem:[%s476_s1 + $0x18] sm:$0xff]  ;;  %317 = vmatprep.subr.bf16.mxu1 %v361_v3  ;;  %308 = vmatprep.mubr.msk.f32.mxu1 %vm362_vm0, %v363_v6 }
   0x3   :  { %12 = vsyncpa [#allocation3], 0  ;;  %v315_v7 = vpack.c.bf16 %v31_v5, %v30_v2  ;;  %v27_v8 = vld [vmem:[%s475_s0] sm:$0xff]  ;;  %vm39_vm1 = vcmask 261120   ;;  %vm113_vm2 = vcmask 523264   ;;  %v129_v20 = vld [vmem:[%s478_s3 + $0x8] sm:$0xff] }
   0x4   :  { %313 = vmatpush3.bf16.msra.mxu0 %v312_v4  ;;  %v261_v9 = vld [vmem:[%s477_s2] ss:$0 sm:$0xff]  ;;  %v130_v22 = vld [vmem:[%s478_s3 + $0x10] sm:$0xff]  ;;  %v131_v23 = vld [vmem:[%s478_s3 + $0x18] sm:$0xff]  ;;  %s364_s30 = smov [#allocation2]  }
   0x5   :  { %314 = vmatprep.subr.bf16.mxu0 %v361_v3  ;;  %v128_v19 = vld [vmem:[%s478_s3] sm:$0xff]  ;;  %v321_v24 = vpack.c.bf16 %v131_v23, %v130_v22  ;;  %v133_v26 = vld [vmem:[%s478_s3 + $0x28] sm:$0xff]  ;;  %v134_v28 = vld [vmem:[%s478_s3 + $0x30] sm:$0xff]  ;;  %s253_s8 = sshll.u32 %s364_s30, 4  ;;  %s254_s8 = int_to_ptr.vmem [resolvable:$true] %s253_s8 }
   0x6   :  { %v318_v21 = vpack.c.bf16 %v129_v20, %v128_v19  ;;  %v132_v25 = vld [vmem:[%s478_s3 + $0x20] sm:$0xff]  ;;  %v135_v29 = vld [vmem:[%s478_s3 + $0x38] sm:$0xff]  ;;  %s337_s9 = scalar_lea.vmem %s254_s8, 128  ;;  %p342_p1 = scmp.lt.s32.totalorder %s254_s8, %s254_s8 }
   0x7   :  { %v324_v27 = vpack.c.bf16 %v133_v26, %v132_v25  ;;  %v327_v30 = vpack.c.bf16 %v135_v29, %v134_v28  ;;  %v263_v36 = vld [vmem:[%s479_s4] ss:$0 sm:$0xff]  ;;  %p338_p0 = scmp.ne.s32.totalorder %s254_s8, %s337_s9  ;;  %p343_p2 = scmp.lt.s32.totalorder %s337_s9, %s337_s9 }
   0x8   :  { %316 = vmatpush3.bf16.msra.mxu0 %v315_v7  ;;  %319 = vmatpush3.bf16.msra.mxu1 %v318_v21  ;;  %v265_v50 = vld [vmem:[%s480_s5] ss:$0 sm:$0xff] }
   0x9   :  { %320 = vmatprep.subr.bf16.mxu1 %v361_v3  ;;  %v266_v52 = vld [vmem:[%s481_s6] ss:$0 sm:$0xff]  ;;  %p344_p3 = por %p343_p2, %p342_p1 }
   0xb   :  { %290 = vmatmul.mubr.msk.f32.vlgmr.msra.gmra.mrb[0].mxu0 %vm39_vm1, %v27_v8  ;;  %p345_p4 = pnand %p344_p3, %p338_p0 }
   0xc   :  { %322 = vmatpush3.bf16.msra.mxu1 %v321_v24 }
   0xd   :  { %323 = vmatprep.subr.bf16.mxu1 %v361_v3 }
  0x10   :  { %325 = vmatpush3.bf16.msra.mxu1 %v324_v27 }
  0x11   :  { %326 = vmatprep.subr.bf16.mxu1 %v361_v3 }
  0x14   :  { %328 = vmatpush3.bf16.msra.mxu1 %v327_v30 }
  0xde   :  { %v109_v10 = vpop.f32.mrb[0].mxu0 }
  0xdf   :  { %v110_v11 = vadd.f32 %v261_v9, %v109_v10  ;;  %v291_v12 = vpop.f32.mrb[1].mxu0 }
  0xe1   :  { %v114_v13 = vsel %vm113_vm2, %v110_v11, 0.0 }
  0xe2   :  { %115 = vadd.xlane.f32.xlu0 %v114_v13 }
 0x16f   :  { %v116_v14 = vpop.xlane.xlu0 %115 }
 0x170   :  { %v118_v15 = vmul.f32 0.015625, %v116_v14 }
 0x172   :  { %v119_v16 = vsub.f32 %v110_v11, %v118_v15 }
 0x174   :  { %v120_v17 = vmul.f32 %v119_v16, %v119_v16 }
 0x176   :  { %v121_v18 = vsel %vm113_vm2, %v120_v17, 0.0 }
 0x177   :  { %122 = vadd.xlane.f32.xlu0 %v121_v18 }
 0x204   :  { %v123_v31 = vpop.xlane.xlu0 %122 }
 0x205   :  { %v124_v32 = vmul.f32 0.015625, %v123_v31 }
 0x207   :  { %v125_v33 = vadd.f32 1e-05, %v124_v32 }
 0x209   :  { %333 = vrsqrt.f32 %v125_v33 }
 0x213   :  { %v334_v34 = vpop.eup %333 }
 0x214   :  { %v127_v35 = vmul.f32 %v334_v34, %v119_v16 }
 0x216   :  { %309 = vmatmul.mubr.msk.f32.vlgmr.msra.gmra.mrb[0].mxu1 %vm113_vm2, %v127_v35 }
 0x2e9   :  { %v212_v37 = vpop.f32.mrb[0].mxu1 }
 0x2ea   :  { %v213_v38 = vadd.f32 %v263_v36, %v212_v37  ;;  %v310_v39 = vpop.f32.mrb[1].mxu1 }
 0x2ec   :  { %v216_v40 = vsel %vm39_vm1, %v213_v38, 0.0 }
 0x2ed   :  { %217 = vadd.xlane.f32.xlu1 %v216_v40 }
 0x37a   :  { %v218_v41 = vpop.xlane.xlu1 %217 }
 0x37b   :  { %v220_v42 = vmul.f32 0.03125, %v218_v41 }
 0x37d   :  { %v221_v43 = vsub.f32 %v213_v38, %v220_v42 }
 0x37f   :  { %v222_v44 = vmul.f32 %v221_v43, %v221_v43 }
 0x381   :  { %v223_v45 = vsel %vm39_vm1, %v222_v44, 0.0 }
 0x382   :  { %224 = vadd.xlane.f32.xlu1 %v223_v45 }
 0x40f   :  { %v225_v46 = vpop.xlane.xlu1 %224 }
 0x410   :  { %v226_v47 = vmul.f32 0.03125, %v225_v46 }
 0x412   :  { %v227_v48 = vadd.f32 1e-05, %v226_v47 }
 0x414   :  { %335 = vrsqrt.f32 %v227_v48 }
 0x41e   :  { %v336_v49 = vpop.eup %335 }
 0x41f   :  { %v229_v51 = vmul.f32 %v336_v49, %v221_v43 }
 0x421   :  { %v237_v53 = vmul.f32 %v265_v50, %v229_v51 }
 0x423   :  { %v245_v54 = vadd.f32 %v266_v52, %v237_v53 }
 0x425   :  { %246 = vst.msk [vmem:[#allocation2] sm:$0xff] %vm39_vm1, %v245_v54 }
 0x426   :  { %348 = shalt.err (!%p345_p4)
}
 0x427   :  { %s349_s11 = scalar_lea.hbm %s482_s7, 128 }
 0x428   :  { %p350_p5 = scmp.ne.s32.totalorder %s482_s7, %s349_s11  ;;  %p353_p6 = scmp.lt.u32.totalorder %s349_s11, %s482_s7 }
 0x42a   :  { %p355_p7 = pnand %p353_p6, %p350_p5 }
 0x42c   :  { %358 = shalt.err (!%p355_p7)
}
 0x42d   :  { %256 = dma.vmem_to_hbm [thread:$0]  %s254_s8, 128, %s482_s7, [#allocation3]  }
 0x42e   :  { %359 = dma.done.wait [#allocation3], 128  }
 0x42f   :  { %360 = vsyncadd [#allocation3], 4294967168 }
 0x430   :  { %260 = vsyncpa [#allocation3], 1 }

</bundles_post_ra>
